<compile_context>
chip_gen: v7x
topology: tpu7x:2x2x1
jax: 0.10.0
libtpu: 0.0.40
codegen_flags: <defaults>
</compile_context>

<pallas_src>
import functools

import numpy as np
import jax
import jax.numpy as jnp
from jax.experimental import pallas as pl
from jax.experimental.pallas import tpu as pltpu


def _round_up(x, m):
    return -(-x // m) * m


def _block_diag(block, n):
    r, c = block.shape
    out = jnp.zeros((n * r, n * c), block.dtype)
    for i in range(n):
        out = out.at[i * r:(i + 1) * r, i * c:(i + 1) * c].set(block)
    return out


# ----------------------------------------------------------------------------
# The single fused kernel (one grid step = one batch tile)
# ----------------------------------------------------------------------------
def _acmodel_kernel(p1_ref, w1_ref, b1_ref, w2_ref, b2_ref, w3_ref, b3_ref,
                    wac1_ref, bac1_ref, wa2_ref, ba2_ref, wc2_ref, bc2_ref,
                    logp_ref, val_ref, *, NP):
    """Fused ACModel forward on one batch tile.

    p1: (4, NP, Bt, 192) lane-packed replicated conv1 im2col rows.
        axis0 = 2x2 pool offset (u,v); axis1 = final spatial position;
        axis2 = batch; lanes = 16 conv-offset combos (e,f,du,dv) x 12 inputs.
    """
    f32 = jnp.float32
    Bt = logp_ref.shape[0]
    cdt = w1_ref.dtype                    # matmul-operand dtype (bf16 or f32)

    # Hoisted weight / bias reads (reused across the pos loop).
    w1 = w1_ref[...]                      # (192, 256) block-diag conv1
    w2 = w2_ref[...]                      # (256, 128) block-structured conv2
    w3 = w3_ref[...]                      # (128, 64)  (e,f)-stacked conv3
    b1 = b1_ref[...]                      # (1, 256)
    b2 = b2_ref[...]                      # (1, 128)
    b3 = b3_ref[...]                      # (1, 64)

    h_acc = jnp.zeros((Bt, 128), f32)
    for pos in range(NP):
        # conv1 over the 4 (u,v) pool offsets, 2x2 max-pool as a running max.
        # Bias add and ReLU commute with the max, so they are applied once.
        m = None
        for uv in range(4):
            a1 = jnp.dot(p1_ref[uv, pos], w1, preferred_element_type=f32)
            m = a1 if m is None else jnp.maximum(m, a1)
        m = jnp.maximum(m + b1, 0.0)      # (Bt, 256) = 16 combos x 16 channels

        # conv2: ONE K=256 matmul over all (e,f,du,dv) lane blocks, + ReLU.
        c2 = jnp.maximum(
            jnp.dot(m.astype(cdt), w2, preferred_element_type=f32) + b2, 0.0)

        # conv3: ONE K=128 matmul over the 4 (e,f) lane blocks, + ReLU.
        emb = jnp.maximum(
            jnp.dot(c2.astype(cdt), w3, preferred_element_type=f32) + b3, 0.0)

        # Fused actor+critic first layer (NCHW flatten absorbed in wac1[pos]).
        h_acc = h_acc + jnp.dot(emb.astype(cdt), wac1_ref[pos],
                                preferred_element_type=f32)

    h = jnp.tanh(h_acc + bac1_ref[...])   # (Bt, 128) f32

    # Epilogue (tiny, kept in f32): zero-padded second-layer weights pick the
    # actor / critic halves of h, so no lane slicing is needed.
    logits = jnp.dot(h, wa2_ref[...], preferred_element_type=f32) + ba2_ref[...]
    z = logits - jnp.max(logits, axis=-1, keepdims=True)
    logp_ref[...] = z - jnp.log(jnp.sum(jnp.exp(z), axis=-1, keepdims=True))
    val_ref[...] = jnp.dot(h, wc2_ref[...], preferred_element_type=f32) + bc2_ref[...]


def _fused_forward(image, II, JJ, w1, b1, w2, b2, w3, b3,
                   wac1, bac1, wa2, ba2, wc2, bc2,
                   *, NP, A, compute_dtype, batch_tile):
    B, _, _, Cin = image.shape
    Bt = batch_tile if batch_tile is not None else min(256, _round_up(B, 8))
    Bt = _round_up(Bt, 8)
    B_pad = _round_up(B, Bt)
    if B_pad != B:
        image = jnp.pad(image, ((0, B_pad - B), (0, 0), (0, 0), (0, 0)))
    L1 = 16 * 4 * Cin                                  # 192 packed input lanes

    # Lane-packed, replicated conv1 im2col rows (single XLA gather; everything
    # downstream stays in VMEM inside one pallas_call, streamed per batch tile).
    g = image[:, II, JJ, :]                            # (B_pad, 4, 16, NP, 4, Cin)
    p1 = jnp.transpose(g, (1, 3, 0, 2, 4, 5)).reshape(4, NP, B_pad, L1)
    p1 = p1.astype(compute_dtype)

    kernel = functools.partial(_acmodel_kernel, NP=NP)
    logp, val = pl.pallas_call(
        kernel,
        grid=(B_pad // Bt,),
        out_shape=(jax.ShapeDtypeStruct((B_pad, A), jnp.float32),
                   jax.ShapeDtypeStruct((B_pad, 1), jnp.float32)),
        in_specs=[
            pl.BlockSpec((4, NP, Bt, L1), lambda i: (0, 0, i, 0)),  # p1 (batch-blocked)
            pl.BlockSpec((192, 256), lambda i: (0, 0)),             # w1 (resident)
            pl.BlockSpec((1, 256), lambda i: (0, 0)),               # b1
            pl.BlockSpec((256, 128), lambda i: (0, 0)),             # w2
            pl.BlockSpec((1, 128), lambda i: (0, 0)),               # b2
            pl.BlockSpec((128, 64), lambda i: (0, 0)),              # w3
            pl.BlockSpec((1, 64), lambda i: (0, 0)),                # b3
            pl.BlockSpec((NP, 64, 128), lambda i: (0, 0, 0)),       # wac1
            pl.BlockSpec((1, 128), lambda i: (0, 0)),               # bac1
            pl.BlockSpec((128, A), lambda i: (0, 0)),               # wa2 (padded)
            pl.BlockSpec((1, A), lambda i: (0, 0)),                 # ba2
            pl.BlockSpec((128, 1), lambda i: (0, 0)),               # wc2 (padded)
            pl.BlockSpec((1, 1), lambda i: (0, 0)),                 # bc2
        ],
        out_specs=(pl.BlockSpec((Bt, A), lambda i: (i, 0)),
                   pl.BlockSpec((Bt, 1), lambda i: (i, 0))),
        compiler_params=pltpu.CompilerParams(
            dimension_semantics=("parallel",),
            vmem_limit_bytes=32 * 1024 * 1024),
    )(p1, w1, b1, w2, b2, w3, b3, wac1, bac1, wa2, ba2, wc2, bc2)
    return logp[:B], val[:B, 0]


def _patch_indices(H3, W3):
    """Image (i, j) gather indices for the lane-packed replicated conv1 im2col.

    Shape (4, 16, H3*W3, 4): axes = (pool offset uv, conv-offset combo
    q=(e,f,du,dv), final spatial position, conv1 2x2 patch element)."""
    NP = H3 * W3
    II = np.zeros((4, 16, NP, 4), np.int32)
    JJ = np.zeros((4, 16, NP, 4), np.int32)
    for u in range(2):
        for v in range(2):
            uv = u * 2 + v
            for e in range(2):
                for f in range(2):
                    for du in range(2):
                        for dv in range(2):
                            q = ((e * 2 + f) * 2 + du) * 2 + dv
                            for r3 in range(H3):
                                for s3 in range(W3):
                                    pos = r3 * W3 + s3
                                    i0 = 2 * (r3 + e + du) + u
                                    j0 = 2 * (s3 + f + dv) + v
                                    for a in range(2):
                                        for b in range(2):
                                            II[uv, q, pos, a * 2 + b] = i0 + a
                                            JJ[uv, q, pos, a * 2 + b] = j0 + b
    return II, JJ


# ----------------------------------------------------------------------------
# Model (parameters + forward), mirroring ACModel.__init__ / forward
# ----------------------------------------------------------------------------
class ACModelPallas:
    def __init__(self, obs_image_shape, n_actions, key,
                 compute_dtype=jnp.bfloat16, batch_tile=None):
        n, m, cin = obs_image_shape
        assert cin == 3
        Hp, Wp = (n - 1) // 2, (m - 1) // 2
        self.H3, self.W3 = Hp - 2, Wp - 2            # final conv spatial size
        assert self.H3 >= 1 and self.W3 >= 1
        self.NP = NP = self.H3 * self.W3
        self.n_actions = A = n_actions
        self.image_embedding_size = NP * 64
        self.semi_memory_size = self.image_embedding_size
        self.memory_size = 2 * self.semi_memory_size
        self.embedding_size = self.image_embedding_size     # no text branch
        E = self.embedding_size

        ks = jax.random.split(key, 10)

        def conv_w(k, ci, co):
            return (jax.random.normal(k, (2, 2, ci, co), jnp.float32)
                    / jnp.sqrt(jnp.float32(ci * 4)))

        def linear_w(k, din, dout):
            # init_params: normal(0,1), each output unit's fan-in unit-L2-normed
            w = jax.random.normal(k, (din, dout), jnp.float32)    # stored (in, out)
            return w / jnp.sqrt(jnp.sum(w * w, axis=0, keepdims=True))

        # image_conv: Conv(3->16) ReLU MaxPool2x2 Conv(16->32) ReLU Conv(32->64) ReLU
        self.cw1 = conv_w(ks[0], 3, 16)
        self.cb1 = 0.01 * jax.random.normal(ks[7], (16,), jnp.float32)
        self.cw2 = conv_w(ks[1], 16, 32)
        self.cb2 = 0.01 * jax.random.normal(ks[8], (32,), jnp.float32)
        self.cw3 = conv_w(ks[2], 32, 64)
        self.cb3 = 0.01 * jax.random.normal(ks[9], (64,), jnp.float32)
        # actor / critic MLPs (Linear biases are zero per init_params)
        self.wa1, self.ba1 = linear_w(ks[3], E, 64), jnp.zeros((64,), jnp.float32)
        self.wa2, self.ba2 = linear_w(ks[4], 64, A), jnp.zeros((A,), jnp.float32)
        self.wc1, self.bc1 = linear_w(ks[5], E, 64), jnp.zeros((64,), jnp.float32)
        self.wc2, self.bc2 = linear_w(ks[6], 64, 1), jnp.zeros((1,), jnp.float32)
        # TODO(synk): use_memory (LSTMCell) and use_text (Embedding+GRU) branches
        # are disabled by default in the spec and are not implemented here.

        # --- kernel-layout constants (reshape / block-diag / pad hoisted) ---
        cdt = compute_dtype
        # conv1: 16 (e,f,du,dv) combos packed along lanes -> block-diag (192,256)
        self.k_w1 = _block_diag(self.cw1.reshape(12, 16), 16).astype(cdt)
        self.k_b1 = jnp.tile(self.cb1, 16).reshape(1, 256)
        # conv2: (du,dv)-stacked (64,32) block, one copy per (e,f) -> (256,128)
        self.k_w2 = _block_diag(self.cw2.reshape(64, 32), 4).astype(cdt)
        self.k_b2 = jnp.tile(self.cb2, 4).reshape(1, 128)
        # conv3: (e,f)-stacked -> (128, 64)
        self.k_w3 = self.cw3.reshape(128, 64).astype(cdt)
        self.k_b3 = self.cb3.reshape(1, 64)
        # Fused actor+critic first layer, NCHW flatten absorbed: (NP, 64, 128)
        wa1_r = self.wa1.reshape(64, NP, 64)
        wc1_r = self.wc1.reshape(64, NP, 64)
        self.k_wac1 = jnp.transpose(
            jnp.concatenate([wa1_r, wc1_r], axis=-1), (1, 0, 2)).astype(cdt)
        self.k_bac1 = jnp.concatenate([self.ba1, self.bc1]).reshape(1, 128)
        # Second layers: zero-padded so they select the actor / critic half of h.
        self.k_wa2 = jnp.concatenate(
            [self.wa2, jnp.zeros((64, A), jnp.float32)], axis=0)        # (128, A)
        self.k_ba2 = self.ba2.reshape(1, A)
        self.k_wc2 = jnp.concatenate(
            [jnp.zeros((64, 1), jnp.float32), self.wc2], axis=0)        # (128, 1)
        self.k_bc2 = self.bc2.reshape(1, 1)

        II, JJ = _patch_indices(self.H3, self.W3)
        self.II, self.JJ = jnp.asarray(II), jnp.asarray(JJ)

        self._fwd = jax.jit(functools.partial(
            _fused_forward, NP=NP, A=A,
            compute_dtype=compute_dtype, batch_tile=batch_tile))

    def forward(self, image, memory):
        # image: (B, H, W, 3) float32 == obs.image before torch's layout transpose
        logp, val = self._fwd(
            image, self.II, self.JJ,
            self.k_w1, self.k_b1, self.k_w2, self.k_b2, self.k_w3, self.k_b3,
            self.k_wac1, self.k_bac1, self.k_wa2, self.k_ba2,
            self.k_wc2, self.k_bc2)
        # "dist" is returned as its (normalized) logits = log-probabilities.
        return logp, val, memory


# ----------------------------------------------------------------------------
# Pure-jnp reference (same params / layout) for numerical validation
# ----------------------------------------------------------------------------
def ref_forward(model, image):
    def conv(x, w, b):
        B, H, W, Cin = x.shape
        Ho, Wo = H - 1, W - 1
        patches = jnp.concatenate(
            [x[:, di:di + Ho, dj:dj + Wo, :] for di in range(2) for dj in range(2)],
            axis=-1)
        y = patches.reshape(B * Ho * Wo, -1) @ w.reshape(-1, w.shape[-1]) + b
        return jnp.maximum(y, 0.0).reshape(B, Ho, Wo, -1)

    x = conv(image, model.cw1, model.cb1)
    x = jnp.max(jnp.stack([x[:, di::2, dj::2, :]
                           for di in range(2) for dj in range(2)]), axis=0)
    x = conv(x, model.cw2, model.cb2)
    x = conv(x, model.cw3, model.cb3)
    B = x.shape[0]
    emb = jnp.transpose(x, (0, 3, 1, 2)).reshape(B, -1)   # torch NCHW flatten
    ha = jnp.tanh(emb @ model.wa1 + model.ba1)
    logp = jax.nn.log_softmax(ha @ model.wa2 + model.ba2, axis=-1)
    hc = jnp.tanh(emb @ model.wc1 + model.bc1)
    value = (hc @ model.wc2 + model.bc2)[:, 0]
    return logp, value


if __name__ == "__main__":
    key = jax.random.PRNGKey(0)
    k_param, k_img, k_img2 = jax.random.split(key, 3)

    B, H, W = 2, 7, 7          # minigrid-style 7x7x3 observation
    N_ACTIONS = 7

    image = jax.random.uniform(k_img, (B, H, W, 3), jnp.float32, 0.0, 5.0)

    # --- default (bf16 matmul operands) path -------------------------------
    model = ACModelPallas((H, W, 3), N_ACTIONS, k_param)
    memory = jnp.zeros((B, model.memory_size), jnp.float32)
    log_probs, value, memory_out = model.forward(image, memory)
    jax.block_until_ready((log_probs, value, memory_out))

    ref_logp, ref_value = ref_forward(model, image)
    assert log_probs.shape == (B, N_ACTIONS) and value.shape == (B,)
    assert memory_out.shape == (B, model.memory_size)
    # bf16 matmul operands => ~1% level rounding; exactness of the layout /
    # packing is validated by the f32-operand variant below.
    assert jnp.allclose(log_probs, ref_logp, atol=1e-1, rtol=5e-2)
    assert jnp.allclose(value, ref_value, atol=1e-1, rtol=5e-2)

    # --- f32-operand variant: tight check of the lane-packed layout --------
    model_f32 = ACModelPallas((H, W, 3), N_ACTIONS, k_param,
                              compute_dtype=jnp.float32)
    logp32, val32, _ = model_f32.forward(image, memory)
    jax.block_until_ready((logp32, val32))
    assert jnp.allclose(logp32, ref_logp, atol=5e-4, rtol=5e-4)
    assert jnp.allclose(val32, ref_value, atol=5e-4, rtol=5e-4)

    # --- multi-tile grid path (batch grid, padding, resident weights) ------
    model_grid = ACModelPallas((H, W, 3), N_ACTIONS, k_param, batch_tile=8)
    Bg = 20                                    # -> B_pad=24, grid=(3,)
    image_g = jax.random.uniform(k_img2, (Bg, H, W, 3), jnp.float32, 0.0, 5.0)
    memory_g = jnp.zeros((Bg, model_grid.memory_size), jnp.float32)
    logp_g, val_g, _ = model_grid.forward(image_g, memory_g)
    jax.block_until_ready((logp_g, val_g))
    ref_logp_g, ref_val_g = ref_forward(model_grid, image_g)
    assert logp_g.shape == (Bg, N_ACTIONS) and val_g.shape == (Bg,)
    assert jnp.allclose(logp_g, ref_logp_g, atol=1e-1, rtol=5e-2)
    assert jnp.allclose(val_g, ref_val_g, atol=1e-1, rtol=5e-2)

    print("KERNEL_OK")
</pallas_src>

<mosaic_0001>
module attributes {stable_mosaic.version = 11 : i64} {
  func.func @_acmodel_kernel(%arg0: i32, %arg1: memref<4x1x8x192xbf16, #tpu.memory_space<vmem>>, %arg2: memref<192x256xbf16, #tpu.memory_space<vmem>>, %arg3: memref<1x256xf32, #tpu.memory_space<vmem>>, %arg4: memref<256x128xbf16, #tpu.memory_space<vmem>>, %arg5: memref<1x128xf32, #tpu.memory_space<vmem>>, %arg6: memref<128x64xbf16, #tpu.memory_space<vmem>>, %arg7: memref<1x64xf32, #tpu.memory_space<vmem>>, %arg8: memref<1x64x128xbf16, #tpu.memory_space<vmem>>, %arg9: memref<1x128xf32, #tpu.memory_space<vmem>>, %arg10: memref<128x7xf32, #tpu.memory_space<vmem>>, %arg11: memref<1x7xf32, #tpu.memory_space<vmem>>, %arg12: memref<128x1xf32, #tpu.memory_space<vmem>>, %arg13: memref<1x1xf32, #tpu.memory_space<vmem>>, %arg14: memref<8x7xf32, #tpu.memory_space<vmem>>, %arg15: memref<8x1xf32, #tpu.memory_space<vmem>>) attributes {dimension_semantics = [#tpu.dimension_semantics<parallel>], iteration_bounds = array<i64: 1>, scalar_prefetch = 0 : i64, scratch_operands = 0 : i64, tpu.core_type = #tpu.core_type<tc>, window_params = [{transform_indices = @transform_0, window_bounds = array<i64: 4, 1, 8, 192>}, {pipeline_mode = #tpu.pipeline_mode<synchronous>, transform_indices = @transform_1, window_bounds = array<i64: 192, 256>}, {pipeline_mode = #tpu.pipeline_mode<synchronous>, transform_indices = @transform_2, window_bounds = array<i64: 1, 256>}, {pipeline_mode = #tpu.pipeline_mode<synchronous>, transform_indices = @transform_3, window_bounds = array<i64: 256, 128>}, {pipeline_mode = #tpu.pipeline_mode<synchronous>, transform_indices = @transform_4, window_bounds = array<i64: 1, 128>}, {pipeline_mode = #tpu.pipeline_mode<synchronous>, transform_indices = @transform_5, window_bounds = array<i64: 128, 64>}, {pipeline_mode = #tpu.pipeline_mode<synchronous>, transform_indices = @transform_6, window_bounds = array<i64: 1, 64>}, {pipeline_mode = #tpu.pipeline_mode<synchronous>, transform_indices = @transform_7, window_bounds = array<i64: 1, 64, 128>}, {pipeline_mode = #tpu.pipeline_mode<synchronous>, transform_indices = @transform_8, window_bounds = array<i64: 1, 128>}, {pipeline_mode = #tpu.pipeline_mode<synchronous>, transform_indices = @transform_9, window_bounds = array<i64: 128, 7>}, {pipeline_mode = #tpu.pipeline_mode<synchronous>, transform_indices = @transform_10, window_bounds = array<i64: 1, 7>}, {pipeline_mode = #tpu.pipeline_mode<synchronous>, transform_indices = @transform_11, window_bounds = array<i64: 128, 1>}, {pipeline_mode = #tpu.pipeline_mode<synchronous>, transform_indices = @transform_12, window_bounds = array<i64: 1, 1>}, {transform_indices = @transform_13, window_bounds = array<i64: 8, 7>}, {transform_indices = @transform_14, window_bounds = array<i64: 8, 1>}]} {
    %c0 = arith.constant 0 : index
    %c0_0 = arith.constant 0 : index
    %0 = vector.load %arg2[%c0, %c0_0] : memref<192x256xbf16, #tpu.memory_space<vmem>>, vector<192x256xbf16>
    %c0_1 = arith.constant 0 : index
    %c0_2 = arith.constant 0 : index
    %1 = vector.load %arg4[%c0_1, %c0_2] : memref<256x128xbf16, #tpu.memory_space<vmem>>, vector<256x128xbf16>
    %c0_3 = arith.constant 0 : index
    %c0_4 = arith.constant 0 : index
    %2 = vector.load %arg6[%c0_3, %c0_4] : memref<128x64xbf16, #tpu.memory_space<vmem>>, vector<128x64xbf16>
    %c0_5 = arith.constant 0 : index
    %c0_6 = arith.constant 0 : index
    %3 = vector.load %arg3[%c0_5, %c0_6] : memref<1x256xf32, #tpu.memory_space<vmem>>, vector<1x256xf32>
    %c0_7 = arith.constant 0 : index
    %c0_8 = arith.constant 0 : index
    %4 = vector.load %arg5[%c0_7, %c0_8] : memref<1x128xf32, #tpu.memory_space<vmem>>, vector<1x128xf32>
    %c0_9 = arith.constant 0 : index
    %c0_10 = arith.constant 0 : index
    %5 = vector.load %arg7[%c0_9, %c0_10] : memref<1x64xf32, #tpu.memory_space<vmem>>, vector<1x64xf32>
    %cst = arith.constant 0.000000e+00 : f32
    %6 = vector.broadcast %cst : f32 to vector<8x128xf32>
    %c0_11 = arith.constant 0 : index
    %c0_12 = arith.constant 0 : index
    %c0_13 = arith.constant 0 : index
    %c0_14 = arith.constant 0 : index
    %7 = vector.load %arg1[%c0_11, %c0_12, %c0_13, %c0_14] : memref<4x1x8x192xbf16, #tpu.memory_space<vmem>>, vector<1x1x8x192xbf16>
    %8 = vector.shape_cast %7 : vector<1x1x8x192xbf16> to vector<8x192xbf16>
    %cst_15 = arith.constant dense<0.000000e+00> : vector<8x256xf32>
    %9 = tpu.matmul %8, %0, %cst_15 {dimension_numbers = #tpu.dot_dimension_numbers<[1], [0], [0], [1], [0, 0, 1, 1], [], []>} : vector<8x192xbf16>, vector<192x256xbf16>, vector<8x256xf32> -> vector<8x256xf32>
    %c1 = arith.constant 1 : index
    %c0_16 = arith.constant 0 : index
    %c0_17 = arith.constant 0 : index
    %c0_18 = arith.constant 0 : index
    %10 = vector.load %arg1[%c1, %c0_16, %c0_17, %c0_18] : memref<4x1x8x192xbf16, #tpu.memory_space<vmem>>, vector<1x1x8x192xbf16>
    %11 = vector.shape_cast %10 : vector<1x1x8x192xbf16> to vector<8x192xbf16>
    %cst_19 = arith.constant dense<0.000000e+00> : vector<8x256xf32>
    %12 = tpu.matmul %11, %0, %cst_19 {dimension_numbers = #tpu.dot_dimension_numbers<[1], [0], [0], [1], [0, 0, 1, 1], [], []>} : vector<8x192xbf16>, vector<192x256xbf16>, vector<8x256xf32> -> vector<8x256xf32>
    %13 = arith.maximumf %9, %12 : vector<8x256xf32>
    %c2 = arith.constant 2 : index
    %c0_20 = arith.constant 0 : index
    %c0_21 = arith.constant 0 : index
    %c0_22 = arith.constant 0 : index
    %14 = vector.load %arg1[%c2, %c0_20, %c0_21, %c0_22] : memref<4x1x8x192xbf16, #tpu.memory_space<vmem>>, vector<1x1x8x192xbf16>
    %15 = vector.shape_cast %14 : vector<1x1x8x192xbf16> to vector<8x192xbf16>
    %cst_23 = arith.constant dense<0.000000e+00> : vector<8x256xf32>
    %16 = tpu.matmul %15, %0, %cst_23 {dimension_numbers = #tpu.dot_dimension_numbers<[1], [0], [0], [1], [0, 0, 1, 1], [], []>} : vector<8x192xbf16>, vector<192x256xbf16>, vector<8x256xf32> -> vector<8x256xf32>
    %17 = arith.maximumf %13, %16 : vector<8x256xf32>
    %c3 = arith.constant 3 : index
    %c0_24 = arith.constant 0 : index
    %c0_25 = arith.constant 0 : index
    %c0_26 = arith.constant 0 : index
    %18 = vector.load %arg1[%c3, %c0_24, %c0_25, %c0_26] : memref<4x1x8x192xbf16, #tpu.memory_space<vmem>>, vector<1x1x8x192xbf16>
    %19 = vector.shape_cast %18 : vector<1x1x8x192xbf16> to vector<8x192xbf16>
    %cst_27 = arith.constant dense<0.000000e+00> : vector<8x256xf32>
    %20 = tpu.matmul %19, %0, %cst_27 {dimension_numbers = #tpu.dot_dimension_numbers<[1], [0], [0], [1], [0, 0, 1, 1], [], []>} : vector<8x192xbf16>, vector<192x256xbf16>, vector<8x256xf32> -> vector<8x256xf32>
    %21 = arith.maximumf %17, %20 : vector<8x256xf32>
    %22 = vector.broadcast %3 : vector<1x256xf32> to vector<8x256xf32>
    %23 = arith.addf %21, %22 : vector<8x256xf32>
    %cst_28 = arith.constant 0.000000e+00 : f32
    %24 = vector.broadcast %cst_28 : f32 to vector<8x256xf32>
    %25 = arith.maximumf %23, %24 : vector<8x256xf32>
    %26 = arith.truncf %25 : vector<8x256xf32> to vector<8x256xbf16>
    %cst_29 = arith.constant dense<0.000000e+00> : vector<8x128xf32>
    %27 = tpu.matmul %26, %1, %cst_29 {dimension_numbers = #tpu.dot_dimension_numbers<[1], [0], [0], [1], [0, 0, 1, 1], [], []>} : vector<8x256xbf16>, vector<256x128xbf16>, vector<8x128xf32> -> vector<8x128xf32>
    %28 = vector.broadcast %4 : vector<1x128xf32> to vector<8x128xf32>
    %29 = arith.addf %27, %28 : vector<8x128xf32>
    %cst_30 = arith.constant 0.000000e+00 : f32
    %30 = vector.broadcast %cst_30 : f32 to vector<8x128xf32>
    %31 = arith.maximumf %29, %30 : vector<8x128xf32>
    %32 = arith.truncf %31 : vector<8x128xf32> to vector<8x128xbf16>
    %cst_31 = arith.constant dense<0.000000e+00> : vector<8x64xf32>
    %33 = tpu.matmul %32, %2, %cst_31 {dimension_numbers = #tpu.dot_dimension_numbers<[1], [0], [0], [1], [0, 0, 1, 1], [], []>} : vector<8x128xbf16>, vector<128x64xbf16>, vector<8x64xf32> -> vector<8x64xf32>
    %34 = vector.broadcast %5 : vector<1x64xf32> to vector<8x64xf32>
    %35 = arith.addf %33, %34 : vector<8x64xf32>
    %cst_32 = arith.constant 0.000000e+00 : f32
    %36 = vector.broadcast %cst_32 : f32 to vector<8x64xf32>
    %37 = arith.maximumf %35, %36 : vector<8x64xf32>
    %38 = arith.truncf %37 : vector<8x64xf32> to vector<8x64xbf16>
    %c0_33 = arith.constant 0 : index
    %c0_34 = arith.constant 0 : index
    %c0_35 = arith.constant 0 : index
    %39 = vector.load %arg8[%c0_33, %c0_34, %c0_35] : memref<1x64x128xbf16, #tpu.memory_space<vmem>>, vector<1x64x128xbf16>
    %40 = vector.shape_cast %39 : vector<1x64x128xbf16> to vector<64x128xbf16>
    %cst_36 = arith.constant dense<0.000000e+00> : vector<8x128xf32>
    %41 = tpu.matmul %38, %40, %cst_36 {dimension_numbers = #tpu.dot_dimension_numbers<[1], [0], [0], [1], [0, 0, 1, 1], [], []>} : vector<8x64xbf16>, vector<64x128xbf16>, vector<8x128xf32> -> vector<8x128xf32>
    %42 = arith.addf %6, %41 : vector<8x128xf32>
    %c0_37 = arith.constant 0 : index
    %c0_38 = arith.constant 0 : index
    %43 = vector.load %arg9[%c0_37, %c0_38] : memref<1x128xf32, #tpu.memory_space<vmem>>, vector<1x128xf32>
    %44 = vector.broadcast %43 : vector<1x128xf32> to vector<8x128xf32>
    %45 = arith.addf %42, %44 : vector<8x128xf32>
    %46 = math.tanh %45 : vector<8x128xf32>
    %c0_39 = arith.constant 0 : index
    %c0_40 = arith.constant 0 : index
    %47 = vector.load %arg10[%c0_39, %c0_40] : memref<128x7xf32, #tpu.memory_space<vmem>>, vector<128x7xf32>
    %cst_41 = arith.constant dense<0.000000e+00> : vector<8x7xf32>
    %48 = tpu.matmul %46, %47, %cst_41 {dimension_numbers = #tpu.dot_dimension_numbers<[1], [0], [0], [1], [0, 0, 1, 1], [], []>} : vector<8x128xf32>, vector<128x7xf32>, vector<8x7xf32> -> vector<8x7xf32>
    %c0_42 = arith.constant 0 : index
    %c0_43 = arith.constant 0 : index
    %49 = vector.load %arg11[%c0_42, %c0_43] : memref<1x7xf32, #tpu.memory_space<vmem>>, vector<1x7xf32>
    %50 = vector.broadcast %49 : vector<1x7xf32> to vector<8x7xf32>
    %51 = arith.addf %48, %50 : vector<8x7xf32>
    %cst_44 = arith.constant dense<0xFF800000> : vector<8xf32>
    %52 = vector.multi_reduction <maximumf>, %51, %cst_44 [1] : vector<8x7xf32> to vector<8xf32>
    %53 = vector.shape_cast %52 : vector<8xf32> to vector<8x1xf32>
    %54 = vector.broadcast %53 : vector<8x1xf32> to vector<8x7xf32>
    %55 = arith.subf %51, %54 : vector<8x7xf32>
    %56 = math.exp %55 : vector<8x7xf32>
    %cst_45 = arith.constant dense<0.000000e+00> : vector<8xf32>
    %57 = vector.multi_reduction <add>, %56, %cst_45 [1] : vector<8x7xf32> to vector<8xf32>
    %58 = vector.shape_cast %57 : vector<8xf32> to vector<8x1xf32>
    %59 = math.log %58 : vector<8x1xf32>
    %60 = vector.broadcast %59 : vector<8x1xf32> to vector<8x7xf32>
    %61 = arith.subf %55, %60 : vector<8x7xf32>
    %c0_46 = arith.constant 0 : index
    %c0_47 = arith.constant 0 : index
    %62 = vector.load %arg14[%c0_46, %c0_47] : memref<8x7xf32, #tpu.memory_space<vmem>>, vector<8x7xf32>
    tpu.vector_store %arg14[%c0_46, %c0_47], %61 {strides = array<i32>} : memref<8x7xf32, #tpu.memory_space<vmem>>, vector<8x7xf32>,
    %c0_48 = arith.constant 0 : index
    %c0_49 = arith.constant 0 : index
    %63 = vector.load %arg12[%c0_48, %c0_49] : memref<128x1xf32, #tpu.memory_space<vmem>>, vector<128x1xf32>
    %cst_50 = arith.constant dense<0.000000e+00> : vector<8x1xf32>
    %64 = tpu.matmul %46, %63, %cst_50 {dimension_numbers = #tpu.dot_dimension_numbers<[1], [0], [0], [1], [0, 0, 1, 1], [], []>} : vector<8x128xf32>, vector<128x1xf32>, vector<8x1xf32> -> vector<8x1xf32>
    %c0_51 = arith.constant 0 : index
    %c0_52 = arith.constant 0 : index
    %65 = vector.load %arg13[%c0_51, %c0_52] : memref<1x1xf32, #tpu.memory_space<vmem>>, vector<1x1xf32>
    %66 = vector.broadcast %65 : vector<1x1xf32> to vector<8x1xf32>
    %67 = arith.addf %64, %66 : vector<8x1xf32>
    %c0_53 = arith.constant 0 : index
    %c0_54 = arith.constant 0 : index
    %68 = vector.load %arg15[%c0_53, %c0_54] : memref<8x1xf32, #tpu.memory_space<vmem>>, vector<8x1xf32>
    tpu.vector_store %arg15[%c0_53, %c0_54], %67 {strides = array<i32>} : memref<8x1xf32, #tpu.memory_space<vmem>>, vector<8x1xf32>,
    return
  }
  func.func @transform_0(%arg0: i32) -> (i32, i32, i32, i32) {
    %c0_i32 = arith.constant 0 : i32
    %c0_i32_0 = arith.constant 0 : i32
    %c0_i32_1 = arith.constant 0 : i32
    %c0_i32_2 = arith.constant 0 : i32
    return %c0_i32, %c0_i32_0, %arg0, %c0_i32_1 : i32, i32, i32, i32
  }
  func.func @transform_1(%arg0: i32) -> (i32, i32) {
    %c0_i32 = arith.constant 0 : i32
    %c0_i32_0 = arith.constant 0 : i32
    %c0_i32_1 = arith.constant 0 : i32
    return %c0_i32, %c0_i32_0 : i32, i32
  }
  func.func @transform_2(%arg0: i32) -> (i32, i32) {
    %c0_i32 = arith.constant 0 : i32
    %c0_i32_0 = arith.constant 0 : i32
    %c0_i32_1 = arith.constant 0 : i32
    return %c0_i32, %c0_i32_0 : i32, i32
  }
  func.func @transform_3(%arg0: i32) -> (i32, i32) {
    %c0_i32 = arith.constant 0 : i32
    %c0_i32_0 = arith.constant 0 : i32
    %c0_i32_1 = arith.constant 0 : i32
    return %c0_i32, %c0_i32_0 : i32, i32
  }
  func.func @transform_4(%arg0: i32) -> (i32, i32) {
    %c0_i32 = arith.constant 0 : i32
    %c0_i32_0 = arith.constant 0 : i32
    %c0_i32_1 = arith.constant 0 : i32
    return %c0_i32, %c0_i32_0 : i32, i32
  }
  func.func @transform_5(%arg0: i32) -> (i32, i32) {
    %c0_i32 = arith.constant 0 : i32
    %c0_i32_0 = arith.constant 0 : i32
    %c0_i32_1 = arith.constant 0 : i32
    return %c0_i32, %c0_i32_0 : i32, i32
  }
  func.func @transform_6(%arg0: i32) -> (i32, i32) {
    %c0_i32 = arith.constant 0 : i32
    %c0_i32_0 = arith.constant 0 : i32
    %c0_i32_1 = arith.constant 0 : i32
    return %c0_i32, %c0_i32_0 : i32, i32
  }
  func.func @transform_7(%arg0: i32) -> (i32, i32, i32) {
    %c0_i32 = arith.constant 0 : i32
    %c0_i32_0 = arith.constant 0 : i32
    %c0_i32_1 = arith.constant 0 : i32
    %c0_i32_2 = arith.constant 0 : i32
    return %c0_i32, %c0_i32_0, %c0_i32_1 : i32, i32, i32
  }
  func.func @transform_8(%arg0: i32) -> (i32, i32) {
    %c0_i32 = arith.constant 0 : i32
    %c0_i32_0 = arith.constant 0 : i32
    %c0_i32_1 = arith.constant 0 : i32
    return %c0_i32, %c0_i32_0 : i32, i32
  }
  func.func @transform_9(%arg0: i32) -> (i32, i32) {
    %c0_i32 = arith.constant 0 : i32
    %c0_i32_0 = arith.constant 0 : i32
    %c0_i32_1 = arith.constant 0 : i32
    return %c0_i32, %c0_i32_0 : i32, i32
  }
  func.func @transform_10(%arg0: i32) -> (i32, i32) {
    %c0_i32 = arith.constant 0 : i32
    %c0_i32_0 = arith.constant 0 : i32
    %c0_i32_1 = arith.constant 0 : i32
    return %c0_i32, %c0_i32_0 : i32, i32
  }
  func.func @transform_11(%arg0: i32) -> (i32, i32) {
    %c0_i32 = arith.constant 0 : i32
    %c0_i32_0 = arith.constant 0 : i32
    %c0_i32_1 = arith.constant 0 : i32
    return %c0_i32, %c0_i32_0 : i32, i32
  }
  func.func @transform_12(%arg0: i32) -> (i32, i32) {
    %c0_i32 = arith.constant 0 : i32
    %c0_i32_0 = arith.constant 0 : i32
    %c0_i32_1 = arith.constant 0 : i32
    return %c0_i32, %c0_i32_0 : i32, i32
  }
  func.func @transform_13(%arg0: i32) -> (i32, i32) {
    %c0_i32 = arith.constant 0 : i32
    %c0_i32_0 = arith.constant 0 : i32
    return %arg0, %c0_i32 : i32, i32
  }
  func.func @transform_14(%arg0: i32) -> (i32, i32) {
    %c0_i32 = arith.constant 0 : i32
    %c0_i32_0 = arith.constant 0 : i32
    return %arg0, %c0_i32 : i32, i32
  }
}

</mosaic_0001>

<bundles_post_ra>
// kernel: _fused_forward.1
= control target key start
LH: loop header
LB: loop body
LE: loop exit
PB: predicated region body
PF: predicated region fallthrough
CT: control target
= control target key end

     0   :  { %vm251_vm0 = vcmask 523264   ;;  %v1382_v52 = vmov 0.0   ;;  %vm1383_vm1 = vmmov 0   ;;  %vm998_vm2 = vcmask 7168   ;;  %s1930_s1 = inlined_call_operand.vmem [shape: bf16[192,256], index: 1, kind: input, shape index: {}]   ;;  %s1931_s0 = inlined_call_operand.vmem [shape: bf16[4,1,8,192], index: 0, kind: input, shape index: {}]   ;;  %s1932_s3 = inlined_call_operand.vmem [shape: bf16[256,128], index: 3, kind: input, shape index: {}]   ;;  %s1933_s5 = inlined_call_operand.vmem [shape: bf16[128,64], index: 5, kind: input, shape index: {}]   ;;  %s1934_s2 = inlined_call_operand.vmem [shape: f32[1,256], index: 2, kind: input, shape index: {}]   ;;  %s1935_s7 = inlined_call_operand.vmem [shape: bf16[1,64,128], index: 7, kind: input, shape index: {}]   ;;  %s1936_s4 = inlined_call_operand.vmem [shape: f32[1,128], index: 4, kind: input, shape index: {}]   ;;  %s1937_s9 = inlined_call_operand.vmem [shape: f32[128,7], index: 9, kind: input, shape index: {}]   ;;  %s1938_s6 = inlined_call_operand.vmem [shape: f32[1,64], index: 6, kind: input, shape index: {}]   ;;  %s1939_s11 = inlined_call_operand.vmem [shape: f32[128,1], index: 11, kind: input, shape index: {}]   ;;  %s1940_s8 = inlined_call_operand.vmem [shape: f32[1,128], index: 8, kind: input, shape index: {}]   ;;  %s1941_s12 = inlined_call_operand.<no memory space> [shape: f32[1,1], index: 12, kind: input, shape index: {}]   ;;  %s1942_s10 = inlined_call_operand.vmem [shape: f32[1,7], index: 10, kind: input, shape index: {}]   ;;  %s1943_s14 = inlined_call_operand.vmem [shape: f32[8,1], index: 14, kind: output, shape index: {1}]   ;;  %s1944_s13 = inlined_call_operand.vmem [shape: f32[8,7], index: 13, kind: output, shape index: {0}]  }
   0x1   :  { %v1463_v0 = vld [vmem:[%s1930_s1 + $0x4] ss:$8 sps:$4 sm:$0xff]   ;;  %v1468_v1 = vld [vmem:[%s1930_s1] ss:$8 sps:$4 sm:$0xff]   ;;  %v1475_v2 = vld [vmem:[%s1930_s1 + $0x14] ss:$8 sps:$4 sm:$0xff]  }
   0x2   :  { %255 = vmatprep.subr.bf16.mxu0 %v1463_v0  ;;  %307 = vmatprep.subr.bf16.mxu1 %v1463_v0  ;;  %v1482_v3 = vld [vmem:[%s1930_s1 + $0x10] ss:$8 sps:$4 sm:$0xff]   ;;  %v1489_v4 = vld [vmem:[%s1930_s1 + $0x24] ss:$8 sps:$4 sm:$0xff]   ;;  %v1496_v5 = vld [vmem:[%s1930_s1 + $0x20] ss:$8 sps:$4 sm:$0xff]  }
   0x3   :  { %256 = vmatpush1.bf16.msra.mxu0 %v1468_v1  ;;  %308 = vmatpush1.bf16.msra.mxu1 %v1468_v1  ;;  %v1503_v6 = vld [vmem:[%s1930_s1 + $0x34] ss:$8 sps:$4 sm:$0xff]   ;;  %v1510_v7 = vld [vmem:[%s1930_s1 + $0x30] ss:$8 sps:$4 sm:$0xff]   ;;  %v1517_v8 = vld [vmem:[%s1930_s1 + $0x44] ss:$8 sps:$4 sm:$0xff]  }
   0x4   :  { %257 = vmatprep.subr.bf16.mxu0 %v1475_v2  ;;  %309 = vmatprep.subr.bf16.mxu1 %v1475_v2  ;;  %v1524_v9 = vld [vmem:[%s1930_s1 + $0x40] ss:$8 sps:$4 sm:$0xff]   ;;  %v1531_v10 = vld [vmem:[%s1930_s1 + $0x54] ss:$8 sps:$4 sm:$0xff]   ;;  %v1544_v15 = vld [vmem:[%s1930_s1 + $0x50] ss:$8 sps:$4 sm:$0xff]  }
   0x5   :  { %v124_v11 = vld [vmem:[%s1931_s0] sm:$0xff]  ;;  %v1035_v12 = vld [vmem:[%s1931_s0 + $0x8] sm:$0xff]  ;;  %v1567_v18 = vld [vmem:[%s1930_s1 + $0x74] ss:$8 sps:$4 sm:$0xff]   ;;  %vm891_vm3 = vcmask 56320  }
   0x6   :  { %v1009_v13 = vcombine.high %v124_v11, %v124_v11  ;;  %v1037_v14 = vcombine.high %v1035_v12, %v1035_v12  ;;  %v1551_v16 = vld [vmem:[%s1930_s1 + $0x64] ss:$8 sps:$4 sm:$0xff]   ;;  %v1560_v17 = vld [vmem:[%s1930_s1 + $0x60] ss:$8 sps:$4 sm:$0xff]   ;;  %v1574_v19 = vld [vmem:[%s1930_s1 + $0x70] ss:$8 sps:$4 sm:$0xff]   ;;  %v1008_v28 = vcombine.low %v124_v11, %v124_v11  ;;  %v1036_v29 = vcombine.low %v1035_v12, %v1035_v12 }
   0x7   :  { %258 = vmatpush1.bf16.msra.mxu0 %v1482_v3  ;;  %310 = vmatpush1.bf16.msra.mxu1 %v1482_v3  ;;  %v1581_v20 = vld [vmem:[%s1930_s1 + $0x84] ss:$8 sps:$4 sm:$0xff]   ;;  %v1588_v21 = vld [vmem:[%s1930_s1 + $0x80] ss:$8 sps:$4 sm:$0xff]   ;;  %v1595_v22 = vld [vmem:[%s1930_s1 + $0x94] ss:$8 sps:$4 sm:$0xff]  }
   0x8   :  { %259 = vmatprep.subr.bf16.mxu0 %v1489_v4  ;;  %311 = vmatprep.subr.bf16.mxu1 %v1489_v4  ;;  %v1602_v23 = vld [vmem:[%s1930_s1 + $0x90] ss:$8 sps:$4 sm:$0xff]   ;;  %v1609_v24 = vld [vmem:[%s1930_s1 + $0xa4] ss:$8 sps:$4 sm:$0xff]   ;;  %v1616_v25 = vld [vmem:[%s1930_s1 + $0xa0] ss:$8 sps:$4 sm:$0xff]  }
   0x9   :  { %1034 = vmatprep.mubr.msk.bf16.mxu0 %vm251_vm0, %v1009_v13  ;;  %1038 = vmatprep.mubr.msk.bf16.mxu1 %vm251_vm0, %v1037_v14  ;;  %v1337_v26 = vld [vmem:[%s1930_s1 + $0xb4] ss:$8 sps:$4 sm:$0xff]   ;;  %v1628_v27 = vld [vmem:[%s1930_s1 + $0xb0] ss:$8 sps:$4 sm:$0xff]   ;;  %v1348_v36 = vld [vmem:[%s1932_s3 + $0x40] sm:$0xff]  }
   0xa   :  { %v1039_v30 = vld [vmem:[%s1931_s0 + $0x10] sm:$0xff]  ;;  %v1043_v31 = vld [vmem:[%s1931_s0 + $0x18] sm:$0xff]  ;;  %v1349_v37 = vld [vmem:[%s1932_s3] sm:$0xff]  }
   0xb   :  { %260 = vmatpush1.bf16.msra.mxu0 %v1496_v5  ;;  %312 = vmatpush1.bf16.msra.mxu1 %v1496_v5  ;;  %v1041_v32 = vcombine.high %v1039_v30, %v1039_v30  ;;  %v1045_v33 = vcombine.high %v1043_v31, %v1043_v31  ;;  %v1040_v34 = vcombine.low %v1039_v30, %v1039_v30  ;;  %v1350_v38 = vld [vmem:[%s1932_s3 + $0x48] sm:$0xff]   ;;  %v1352_v40 = vld [vmem:[%s1932_s3 + $0x50] sm:$0xff]   ;;  %v1354_v42 = vld [vmem:[%s1932_s3 + $0x58] sm:$0xff]  }
   0xc   :  { %261 = vmatprep.subr.bf16.mxu0 %v1503_v6  ;;  %313 = vmatprep.subr.bf16.mxu1 %v1503_v6  ;;  %v1044_v35 = vcombine.low %v1043_v31, %v1043_v31  ;;  %v1351_v39 = vld [vmem:[%s1932_s3 + $0x8] sm:$0xff]   ;;  %v1353_v41 = vld [vmem:[%s1932_s3 + $0x10] sm:$0xff]   ;;  %v1355_v43 = vld [vmem:[%s1932_s3 + $0x18] sm:$0xff]  }
   0xd   :  { %v1356_v44 = vld [vmem:[%s1932_s3 + $0x60] sm:$0xff]   ;;  %v1358_v46 = vld [vmem:[%s1932_s3 + $0x68] sm:$0xff]   ;;  %v1360_v48 = vld [vmem:[%s1932_s3 + $0x70] sm:$0xff]  }
   0xe   :  { %v1357_v45 = vld [vmem:[%s1932_s3 + $0x20] sm:$0xff]   ;;  %v1359_v47 = vld [vmem:[%s1932_s3 + $0x28] sm:$0xff]   ;;  %v1361_v49 = vld [vmem:[%s1932_s3 + $0x30] sm:$0xff]  }
   0xf   :  { %262 = vmatpush1.bf16.msra.mxu0 %v1510_v7  ;;  %314 = vmatpush1.bf16.msra.mxu1 %v1510_v7  ;;  %v1362_v50 = vld [vmem:[%s1932_s3 + $0x78] sm:$0xff]   ;;  %v1364_v53 = vld [vmem:[%s1933_s5] sm:$0xff]   ;;  %v1365_v54 = vld [vmem:[%s1933_s5 + $0x8] sm:$0xff]  }
  0x10   :  { %263 = vmatprep.subr.bf16.mxu0 %v1517_v8  ;;  %315 = vmatprep.subr.bf16.mxu1 %v1517_v8  ;;  %v1363_v51 = vld [vmem:[%s1932_s3 + $0x38] sm:$0xff]   ;;  %v1366_v55 = vld [vmem:[%s1933_s5 + $0x10] sm:$0xff]   ;;  %v1368_v57 = vld [vmem:[%s1933_s5 + $0x20] sm:$0xff]  }
  0x11   :  { %v1367_v56 = vld [vmem:[%s1933_s5 + $0x18] sm:$0xff]   ;;  %v1369_v58 = vld [vmem:[%s1933_s5 + $0x28] sm:$0xff]   ;;  %v1370_v30 = vld [vmem:[%s1933_s5 + $0x30] sm:$0xff]  }
  0x12   :  { %v1371_v31 = vld [vmem:[%s1933_s5 + $0x38] sm:$0xff]  }
  0x13   :  { %264 = vmatpush1.bf16.msra.mxu0 %v1524_v9  ;;  %316 = vmatpush1.bf16.msra.mxu1 %v1524_v9 }
  0x14   :  { %265 = vmatprep.subr.bf16.mxu0 %v1531_v10  ;;  %317 = vmatprep.subr.bf16.mxu1 %v1531_v10 }
  0x17   :  { %266 = vmatpush1.bf16.msra.mxu0 %v1544_v15  ;;  %318 = vmatpush1.bf16.msra.mxu1 %v1544_v15 }
  0x18   :  { %267 = vmatprep.subr.bf16.mxu0 %v1551_v16  ;;  %319 = vmatprep.subr.bf16.mxu1 %v1551_v16 }
  0x1b   :  { %268 = vmatpush1.bf16.msra.mxu0 %v1560_v17  ;;  %320 = vmatpush1.bf16.msra.mxu1 %v1560_v17 }
  0x1c   :  { %269 = vmatprep.subr.bf16.mxu0 %v1567_v18  ;;  %321 = vmatprep.subr.bf16.mxu1 %v1567_v18 }
  0x1f   :  { %270 = vmatpush1.bf16.msra.mxu0 %v1574_v19  ;;  %322 = vmatpush1.bf16.msra.mxu1 %v1574_v19 }
  0x20   :  { %271 = vmatprep.subr.bf16.mxu0 %v1581_v20  ;;  %323 = vmatprep.subr.bf16.mxu1 %v1581_v20 }
  0x23   :  { %272 = vmatpush1.bf16.msra.mxu0 %v1588_v21  ;;  %324 = vmatpush1.bf16.msra.mxu1 %v1588_v21 }
  0x24   :  { %273 = vmatprep.subr.bf16.mxu0 %v1595_v22  ;;  %325 = vmatprep.subr.bf16.mxu1 %v1595_v22 }
  0x27   :  { %274 = vmatpush1.bf16.msra.mxu0 %v1602_v23  ;;  %326 = vmatpush1.bf16.msra.mxu1 %v1602_v23 }
  0x28   :  { %275 = vmatprep.subr.bf16.mxu0 %v1609_v24  ;;  %327 = vmatprep.subr.bf16.mxu1 %v1609_v24 }
  0x2b   :  { %276 = vmatpush1.bf16.msra.mxu0 %v1616_v25  ;;  %328 = vmatpush1.bf16.msra.mxu1 %v1616_v25 }
  0x2c   :  { %277 = vmatprep.subr.bf16.mxu0 %v1337_v26  ;;  %329 = vmatprep.subr.bf16.mxu1 %v1337_v26 }
  0x2f   :  { %278 = vmatpush1.bf16.msra.mxu0 %v1628_v27  ;;  %330 = vmatpush1.bf16.msra.mxu1 %v1628_v27 }
  0x30   :  { %361 = vmatprep.subr.bf16.mxu0 %v1463_v0  ;;  %415 = vmatprep.subr.bf16.mxu1 %v1463_v0 }
  0x32   :  { %288 = vmatmul.mubr.bf16.vlgmr.msra.gmra.mrb[0].mxu0 %v1008_v28  ;;  %340 = vmatmul.mubr.bf16.vlgmr.msra.gmra.mrb[0].mxu1 %v1036_v29 }
  0x33   :  { %362 = vmatpush1.bf16.msra.mxu0 %v1468_v1  ;;  %416 = vmatpush1.bf16.msra.mxu1 %v1468_v1 }
  0x34   :  { %363 = vmatprep.subr.bf16.mxu0 %v1475_v2  ;;  %417 = vmatprep.subr.bf16.mxu1 %v1475_v2 }
  0x35   :  { %1042 = vmatprep.mubr.msk.bf16.mxu0 %vm251_vm0, %v1041_v32  ;;  %1046 = vmatprep.mubr.msk.bf16.mxu1 %vm251_vm0, %v1045_v33  ;;  %v1372_v32 = vld [vmem:[%s1935_s7] sm:$0xff]   ;;  %v1373_v33 = vld [vmem:[%s1935_s7 + $0x8] sm:$0xff]  }
  0x37   :  { %364 = vmatpush1.bf16.msra.mxu0 %v1482_v3  ;;  %418 = vmatpush1.bf16.msra.mxu1 %v1482_v3 }
  0x38   :  { %365 = vmatprep.subr.bf16.mxu0 %v1489_v4  ;;  %419 = vmatprep.subr.bf16.mxu1 %v1489_v4 }
  0x3b   :  { %366 = vmatpush1.bf16.msra.mxu0 %v1496_v5  ;;  %420 = vmatpush1.bf16.msra.mxu1 %v1496_v5  ;;  %v459_v5 = vlaneseq }
  0x3c   :  { %367 = vmatprep.subr.bf16.mxu0 %v1503_v6  ;;  %421 = vmatprep.subr.bf16.mxu1 %v1503_v6 }
  0x3d   :  { %v460_v6 = vshrl.u32 %v459_v5, 7 }
  0x3f   :  { %368 = vmatpush1.bf16.msra.mxu0 %v1510_v7  ;;  %422 = vmatpush1.bf16.msra.mxu1 %v1510_v7  ;;  %v461_v7 = vsub.s32 0, %v460_v6 }
  0x40   :  { %369 = vmatprep.subr.bf16.mxu0 %v1517_v8  ;;  %423 = vmatprep.subr.bf16.mxu1 %v1517_v8  ;;  %v121_v8 = vld [vmem:[%s1934_s2] sm:$0x3] }
  0x41   :  { %v462_v13 = vrot.slane %v121_v8, %v461_v7 }
  0x43   :  { %370 = vmatpush1.bf16.msra.mxu0 %v1524_v9  ;;  %424 = vmatpush1.bf16.msra.mxu1 %v1524_v9  ;;  %v465_v9 = vsub.s32 1, %v460_v6 }
  0x44   :  { %371 = vmatprep.subr.bf16.mxu0 %v1531_v10  ;;  %425 = vmatprep.subr.bf16.mxu1 %v1531_v10 }
  0x47   :  { %372 = vmatpush1.bf16.msra.mxu0 %v1544_v15  ;;  %426 = vmatpush1.bf16.msra.mxu1 %v1544_v15 }
  0x48   :  { %373 = vmatprep.subr.bf16.mxu0 %v1551_v16  ;;  %427 = vmatprep.subr.bf16.mxu1 %v1551_v16 }
  0x4b   :  { %374 = vmatpush1.bf16.msra.mxu0 %v1560_v17  ;;  %428 = vmatpush1.bf16.msra.mxu1 %v1560_v17  ;;  %v466_v17 = vrot.slane %v121_v8, %v465_v9  ;;  %v907_v9 = vld [vmem:[%s1939_s11 + $0x10] sm:$0xff] }
  0x4c   :  { %375 = vmatprep.subr.bf16.mxu0 %v1567_v18  ;;  %429 = vmatprep.subr.bf16.mxu1 %v1567_v18 }
  0x4f   :  { %376 = vmatpush1.bf16.msra.mxu0 %v1574_v19  ;;  %430 = vmatpush1.bf16.msra.mxu1 %v1574_v19 }
  0x50   :  { %377 = vmatprep.subr.bf16.mxu0 %v1581_v20  ;;  %431 = vmatprep.subr.bf16.mxu1 %v1581_v20 }
  0x53   :  { %378 = vmatpush1.bf16.msra.mxu0 %v1588_v21  ;;  %432 = vmatpush1.bf16.msra.mxu1 %v1588_v21 }
  0x54   :  { %379 = vmatprep.subr.bf16.mxu0 %v1595_v22  ;;  %433 = vmatprep.subr.bf16.mxu1 %v1595_v22 }
  0x57   :  { %380 = vmatpush1.bf16.msra.mxu0 %v1602_v23  ;;  %434 = vmatpush1.bf16.msra.mxu1 %v1602_v23 }
  0x58   :  { %381 = vmatprep.subr.bf16.mxu0 %v1609_v24  ;;  %435 = vmatprep.subr.bf16.mxu1 %v1609_v24 }
  0x5b   :  { %382 = vmatpush1.bf16.msra.mxu0 %v1616_v25  ;;  %436 = vmatpush1.bf16.msra.mxu1 %v1616_v25 }
  0x5c   :  { %383 = vmatprep.subr.bf16.mxu0 %v1337_v26  ;;  %437 = vmatprep.subr.bf16.mxu1 %v1337_v26 }
  0x5f   :  { %384 = vmatpush1.bf16.msra.mxu0 %v1628_v27  ;;  %438 = vmatpush1.bf16.msra.mxu1 %v1628_v27 }
  0x60   :  { %1081 = vmatprep.subr.bf16.mxu0 %v1348_v36  ;;  %1151 = vmatprep.subr.bf16.mxu1 %v1382_v52 }
  0x62   :  { %394 = vmatmul.mubr.bf16.vlgmr.msra.gmra.mrb[4].mxu0 %v1040_v34  ;;  %448 = vmatmul.mubr.bf16.vlgmr.msra.gmra.mrb[4].mxu1 %v1044_v35  ;;  %v1047_v35 = vld [vmem:[%s1936_s4] ss:$0 sm:$0xff] }
  0x63   :  { %1082 = vmatpush3.bf16.msra.mxu0 %v1349_v37  ;;  %1152 = vmatpush3.bf16.msra.mxu1 %v1364_v53  ;;  %v802_v53 = vld [vmem:[%s1937_s9 + $0x20] sm:$0xff] }
  0x64   :  { %1083 = vmatprep.subr.bf16.mxu0 %v1350_v38  ;;  %1153 = vmatprep.subr.bf16.mxu1 %v1382_v52 }
  0x65   :  { %1167 = vmatprep.mubr.msk.bf16.mxu1 %vm1383_vm1, %v1382_v52 }
  0x67   :  { %1084 = vmatpush3.bf16.msra.mxu0 %v1351_v39  ;;  %1154 = vmatpush3.bf16.msra.mxu1 %v1365_v54  ;;  %v803_v54 = vld [vmem:[%s1937_s9 + $0x28] sm:$0xff] }
  0x68   :  { %1085 = vmatprep.subr.bf16.mxu0 %v1352_v40  ;;  %1155 = vmatprep.subr.bf16.mxu1 %v1382_v52 }
  0x6b   :  { %1086 = vmatpush3.bf16.msra.mxu0 %v1353_v41  ;;  %1156 = vmatpush3.bf16.msra.mxu1 %v1366_v55  ;;  %v1260_v55 = vpack.c.bf16 %v803_v54, %v802_v53 }
  0x6c   :  { %1087 = vmatprep.subr.bf16.mxu0 %v1354_v42  ;;  %1157 = vmatprep.subr.bf16.mxu1 %v1382_v52 }
  0x6f   :  { %1088 = vmatpush3.bf16.msra.mxu0 %v1355_v43  ;;  %1158 = vmatpush3.bf16.msra.mxu1 %v1367_v56  ;;  %v1374_v43 = vld [vmem:[%s1935_s7 + $0x10] sm:$0xff]  }
  0x70   :  { %1089 = vmatprep.subr.bf16.mxu0 %v1356_v44  ;;  %1159 = vmatprep.subr.bf16.mxu1 %v1382_v52  ;;  %v1375_v44 = vld [vmem:[%s1935_s7 + $0x18] sm:$0xff]   ;;  %v804_v56 = vld [vmem:[%s1937_s9 + $0x30] sm:$0xff] }
  0x73   :  { %1090 = vmatpush3.bf16.msra.mxu0 %v1357_v45  ;;  %1160 = vmatpush3.bf16.msra.mxu1 %v1368_v57  ;;  %v1384_v45 = vmov 0.0|0.0   ;;  %v805_v57 = vld [vmem:[%s1937_s9 + $0x38] sm:$0xff] }
  0x74   :  { %1091 = vmatprep.subr.bf16.mxu0 %v1358_v46  ;;  %1161 = vmatprep.subr.bf16.mxu1 %v1382_v52  ;;  %v798_v46 = vld [vmem:[%s1937_s9] sm:$0xff] }
  0x77   :  { %1092 = vmatpush3.bf16.msra.mxu0 %v1359_v47  ;;  %1162 = vmatpush3.bf16.msra.mxu1 %v1369_v58  ;;  %v799_v47 = vld [vmem:[%s1937_s9 + $0x8] sm:$0xff]  ;;  %v1263_v58 = vpack.c.bf16 %v805_v57, %v804_v56 }
  0x78   :  { %1093 = vmatprep.subr.bf16.mxu0 %v1360_v48  ;;  %1163 = vmatprep.subr.bf16.mxu1 %v1382_v52  ;;  %v1254_v48 = vpack.c.bf16 %v799_v47, %v798_v46  ;;  %v20_v46 = vstv %s1941_s12 }
  0x79   :  { %21 = vst [vmem:[#allocation2] sm:$0x1] %v20_v46 }
  0x7b   :  { %1094 = vmatpush3.bf16.msra.mxu0 %v1361_v49  ;;  %1164 = vmatpush3.bf16.msra.mxu1 %v1370_v30  ;;  %v800_v49 = vld [vmem:[%s1937_s9 + $0x10] sm:$0xff]  ;;  %v918_v30 = vld [vmem:[%s1939_s11 + $0x68] sm:$0xff] }
  0x7c   :  { %1095 = vmatprep.subr.bf16.mxu0 %v1362_v50  ;;  %1165 = vmatprep.subr.bf16.mxu1 %v1382_v52  ;;  %v801_v50 = vld [vmem:[%s1937_s9 + $0x18] sm:$0xff] }
  0x7f   :  { %1096 = vmatpush3.bf16.msra.mxu0 %v1363_v51  ;;  %1166 = vmatpush3.bf16.msra.mxu1 %v1371_v31  ;;  %v1257_v51 = vpack.c.bf16 %v801_v50, %v800_v49  ;;  %v812_v31 = vld [vmem:[%s1937_s9 + $0x70] sm:$0xff] }
  0x80   :  { %1171 = vmatprep.subr.bf16.mxu0 %v1382_v52  ;;  %1253 = vmatprep.subr.bf16.mxu1 %v1384_v45  ;;  %v1080_v47 = vld [vmem:[#allocation2] ss:$0 sm:$0xff] }
 0x105   :  { %v289_v59 = vpop.f32.mrb[0].mxu0  ;;  %v341_v60 = vpop.f32.mrb[0].mxu1 }
 0x106   :  { %v348_v61 = vmax.f32 %v289_v59, %v341_v60  ;;  %v291_v62 = vpop.f32.mrb[1].mxu0  ;;  %v343_v63 = vpop.f32.mrb[1].mxu1  ;;  %v806_v59 = vld [vmem:[%s1937_s9 + $0x40] sm:$0xff]  ;;  %v807_v60 = vld [vmem:[%s1937_s9 + $0x48] sm:$0xff] }
 0x107   :  { %v349_v0 = vmax.f32 %v291_v62, %v343_v63  ;;  %v293_v1 = vpop.f32.mrb[2].mxu0  ;;  %v345_v2 = vpop.f32.mrb[2].mxu1  ;;  %v1064_v62 = vld [vmem:[%s1938_s6] ss:$0 sm:$0xff] }
 0x108   :  { %v294_v3 = vpop.f32.mrb[3].mxu0  ;;  %v346_v4 = vpop.f32.mrb[3].mxu1  ;;  %v905_v2 = vld [vmem:[%s1939_s11] sm:$0xff] }
 0x109   :  { %v906_v3 = vld [vmem:[%s1939_s11 + $0x8] sm:$0xff] }
 0x10a   :  { %v1278_v7 = vpack.c.bf16 %v906_v3, %v905_v2 }
 0x135   :  { %v395_v10 = vpop.f32.mrb[4].mxu0  ;;  %v449_v11 = vpop.f32.mrb[4].mxu1 }
 0x136   :  { %v402_v12 = vmax.f32 %v348_v61, %v395_v10  ;;  %v397_v14 = vpop.f32.mrb[5].mxu0  ;;  %v451_v15 = vpop.f32.mrb[5].mxu1  ;;  %v1266_v61 = vpack.c.bf16 %v807_v60, %v806_v59  ;;  %v908_v10 = vld [vmem:[%s1939_s11 + $0x18] sm:$0xff] }
 0x137   :  { %v403_v16 = vmax.f32 %v349_v0, %v397_v14  ;;  %v399_v18 = vpop.f32.mrb[6].mxu0  ;;  %v453_v19 = vpop.f32.mrb[6].mxu1 }
 0x138   :  { %v456_v20 = vmax.f32 %v402_v12, %v449_v11  ;;  %v400_v21 = vpop.f32.mrb[7].mxu0  ;;  %v454_v22 = vpop.f32.mrb[7].mxu1  ;;  %v1281_v11 = vpack.c.bf16 %v908_v10, %v907_v9  ;;  %v909_v12 = vld [vmem:[%s1939_s11 + $0x20] sm:$0xff]  ;;  %v914_v18 = vld [vmem:[%s1939_s11 + $0x48] sm:$0xff] }
 0x139   :  { %v457_v23 = vmax.f32 %v403_v16, %v451_v15  ;;  %v911_v15 = vld [vmem:[%s1939_s11 + $0x30] sm:$0xff]  ;;  %v809_v21 = vld [vmem:[%s1937_s9 + $0x58] sm:$0xff] }
 0x13a   :  { %v469_v24 = vadd.f32 %v462_v13, %v456_v20  ;;  %v910_v13 = vld [vmem:[%s1939_s11 + $0x28] sm:$0xff]  ;;  %v808_v20 = vld [vmem:[%s1937_s9 + $0x50] sm:$0xff] }
 0x13b   :  { %v470_v25 = vadd.f32 %v466_v17, %v457_v23  ;;  %v1284_v14 = vpack.c.bf16 %v910_v13, %v909_v12  ;;  %v913_v17 = vld [vmem:[%s1939_s11 + $0x40] sm:$0xff]  ;;  %v915_v22 = vld [vmem:[%s1939_s11 + $0x50] sm:$0xff]  ;;  %v1269_v23 = vpack.c.bf16 %v809_v21, %v808_v20 }
 0x13c   :  { %v471_v26 = vmax.f32 %v469_v24, 0.0  ;;  %v1290_v19 = vpack.c.bf16 %v914_v18, %v913_v17  ;;  %v916_v24 = vld [vmem:[%s1939_s11 + $0x58] sm:$0xff] }
 0x13d   :  { %v472_v27 = vmax.f32 %v470_v25, 0.0  ;;  %v1293_v25 = vpack.c.bf16 %v916_v24, %v915_v22 }
 0x13e   :  { %v473_v29 = vpack.c.bf16 %v471_v26, %v471_v26  ;;  %v810_v26 = vld [vmem:[%s1937_s9 + $0x60] sm:$0xff] }
 0x13f   :  { %v474_v28 = vpack.c.bf16 %v472_v27, %v472_v27  ;;  %v811_v27 = vld [vmem:[%s1937_s9 + $0x68] sm:$0xff] }
 0x141   :  { %609 = vmatprep.mubr.bf16.mxu0 %v474_v28  ;;  %v917_v28 = vld [vmem:[%s1939_s11 + $0x60] sm:$0xff] }
 0x142   :  { %610 = vmatmul.mubr.bf16.vlgmr.msra.gmra.mrb[8].mxu0 %v473_v29  ;;  %v1272_v29 = vpack.c.bf16 %v811_v27, %v810_v26 }
 0x143   :  { %1179 = vmatprep.mubr.msk.bf16.mxu0 %vm1383_vm1, %v1382_v52  ;;  %1172 = vmatpush3.bf16.msra.mxu0 %v1372_v32  ;;  %v813_v32 = vld [vmem:[%s1937_s9 + $0x78] sm:$0xff] }
 0x144   :  { %1173 = vmatprep.subr.bf16.mxu0 %v1382_v52 }
 0x147   :  { %1174 = vmatpush3.bf16.msra.mxu0 %v1373_v33  ;;  %v1296_v33 = vpack.c.bf16 %v918_v30, %v917_v28 }
 0x148   :  { %1175 = vmatprep.subr.bf16.mxu0 %v1382_v52 }
 0x14b   :  { %1176 = vmatpush3.bf16.msra.mxu0 %v1374_v43 }
 0x14c   :  { %1177 = vmatprep.subr.bf16.mxu0 %v1382_v52 }
 0x14f   :  { %1178 = vmatpush3.bf16.msra.mxu0 %v1375_v44 }
 0x150   :  { %1277 = vmatprep.subr.bf16.mxu0 %v1384_v45 }
 0x215   :  { %v1097_v34 = vpop.f32.mrb[8].mxu0 }
 0x216   :  { %v1098_v36 = vpop.f32.mrb[9].mxu0 }
 0x217   :  { %v1099_v37 = vadd.f32 %v1098_v36, %v1097_v34  ;;  %v1100_v38 = vpop.f32.mrb[10].mxu0  ;;  %v919_v34 = vld [vmem:[%s1939_s11 + $0x70] sm:$0xff]  ;;  %v1275_v36 = vpack.c.bf16 %v813_v32, %v812_v31 }
 0x218   :  { %v1101_v39 = vpop.f32.mrb[11].mxu0  ;;  %v1073_v38 = vld [vmem:[%s1940_s8] ss:$0 sm:$0xff] }
 0x219   :  { %v612_v40 = vadd.f32 %v1099_v37, %v1047_v35  ;;  %v920_v35 = vld [vmem:[%s1939_s11 + $0x78] sm:$0xff] }
 0x21a   :  { %v1299_v37 = vpack.c.bf16 %v920_v35, %v919_v34 }
 0x21b   :  { %v617_v41 = vmax.f32 %v612_v40, 0.0 }
 0x21d   :  { %v618_v42 = vpack.c.bf16 %v617_v41, %v617_v41 }
 0x21f   :  { %1168 = vmatmul.mubr.bf16.vlgmr.msra.gmra.mrb[8].mxu1 %v618_v42 }
 0x220   :  { %1215 = vmatprep.mubr.msk.f32.mxu1 %vm1383_vm1, %v1382_v52  ;;  %1255 = vmatpush3.bf16.msra.mxu1 %v1254_v48 }
 0x221   :  { %1256 = vmatprep.subr.bf16.mxu1 %v1384_v45 }
 0x224   :  { %1258 = vmatpush3.bf16.msra.mxu1 %v1257_v51 }
 0x225   :  { %1259 = vmatprep.subr.bf16.mxu1 %v1384_v45 }
 0x228   :  { %1261 = vmatpush3.bf16.msra.mxu1 %v1260_v55 }
 0x229   :  { %1262 = vmatprep.subr.bf16.mxu1 %v1384_v45 }
 0x22c   :  { %1264 = vmatpush3.bf16.msra.mxu1 %v1263_v58 }
 0x22d   :  { %1265 = vmatprep.subr.bf16.mxu1 %v1384_v45 }
 0x230   :  { %1267 = vmatpush3.bf16.msra.mxu1 %v1266_v61 }
 0x231   :  { %1268 = vmatprep.subr.bf16.mxu1 %v1384_v45 }
 0x234   :  { %1270 = vmatpush3.bf16.msra.mxu1 %v1269_v23 }
 0x235   :  { %1271 = vmatprep.subr.bf16.mxu1 %v1384_v45 }
 0x238   :  { %1273 = vmatpush3.bf16.msra.mxu1 %v1272_v29 }
 0x239   :  { %1274 = vmatprep.subr.bf16.mxu1 %v1384_v45 }
 0x23c   :  { %1276 = vmatpush3.bf16.msra.mxu1 %v1275_v36 }
 0x2f2   :  { %v707_v63 = vpop.f32.mrb[8].mxu1 }
 0x2f3   :  { %v708_v0 = vadd.f32 %v1064_v62, %v707_v63  ;;  %v1169_v1 = vpop.f32.mrb[9].mxu1 }
 0x2f4   :  { %v710_v4 = vpop.f32.mrb[10].mxu1 }
 0x2f5   :  { %v713_v5 = vmax.f32 %v708_v0, 0.0  ;;  %v1170_v6 = vpop.f32.mrb[11].mxu1 }
 0x2f7   :  { %v714_v8 = vpack.c.bf16 %v713_v5, %v713_v5 }
 0x2f9   :  { %1180 = vmatmul.mubr.msk.bf16.vlgmr.msra.gmra.mrb[12].mxu0 %vm251_vm0, %v714_v8 }
 0x2fa   :  { %1279 = vmatpush3.bf16.msra.mxu0 %v1278_v7  ;;  %1250 = vmatprep.mubr.msk.f32.mxu0 %vm1383_vm1, %v1382_v52  ;;  %v912_v52 = vld [vmem:[%s1939_s11 + $0x38] sm:$0xff] }
 0x2fb   :  { %1280 = vmatprep.subr.bf16.mxu0 %v1384_v45  ;;  %v1287_v16 = vpack.c.bf16 %v912_v52, %v911_v15 }
 0x2fe   :  { %1282 = vmatpush3.bf16.msra.mxu0 %v1281_v11 }
 0x2ff   :  { %1283 = vmatprep.subr.bf16.mxu0 %v1384_v45 }
 0x302   :  { %1285 = vmatpush3.bf16.msra.mxu0 %v1284_v14 }
 0x303   :  { %1286 = vmatprep.subr.bf16.mxu0 %v1384_v45 }
 0x306   :  { %1288 = vmatpush3.bf16.msra.mxu0 %v1287_v16 }
 0x307   :  { %1289 = vmatprep.subr.bf16.mxu0 %v1384_v45 }
 0x30a   :  { %1291 = vmatpush3.bf16.msra.mxu0 %v1290_v19 }
 0x30b   :  { %1292 = vmatprep.subr.bf16.mxu0 %v1384_v45 }
 0x30e   :  { %1294 = vmatpush3.bf16.msra.mxu0 %v1293_v25 }
 0x30f   :  { %1295 = vmatprep.subr.bf16.mxu0 %v1384_v45 }
 0x312   :  { %1297 = vmatpush3.bf16.msra.mxu0 %v1296_v33 }
 0x313   :  { %1298 = vmatprep.subr.bf16.mxu0 %v1384_v45  ;;  %v1079_v45 = vld [vmem:[%s1942_s10] ss:$0 sm:$0xff] }
 0x316   :  { %1300 = vmatpush3.bf16.msra.mxu0 %v1299_v37 }
 0x3cc   :  { %v791_v39 = vpop.f32.mrb[12].mxu0 }
 0x3cd   :  { %v792_v40 = vadd.f32 %v1073_v38, %v791_v39  ;;  %v1181_v41 = vpop.f32.mrb[13].mxu0 }
 0x3ce   :  { %v794_v42 = vpop.f32.mrb[14].mxu0 }
 0x3cf   :  { %1376 = vtanh.f32 %v792_v40  ;;  %v1182_v43 = vpop.f32.mrb[15].mxu0 }
 0x3d9   :  { %v1377_v44 = vpop.eup %1376 }
 0x3da   :  { %1216 = vmatmul.mubr.f32.vlgmr.msra.gmra.mrb[12].mxu1 %v1377_v44  ;;  %1251 = vmatmul.mubr.f32.vlgmr.msra.gmra.mrb[16].mxu0 %v1377_v44 }
 0x4ad   :  { %v887_v48 = vpop.f32.mrb[12].mxu1  ;;  %v994_v49 = vpop.f32.mrb[16].mxu0 }
 0x4ae   :  { %v888_v50 = vadd.f32 %v1079_v45, %v887_v48  ;;  %v995_v51 = vadd.f32 %v1080_v47, %v994_v49  ;;  %v1217_v53 = vpop.f32.mrb[13].mxu1  ;;  %v1252_v54 = vpop.f32.mrb[17].mxu0 }
 0x4b0   :  { %999 = vst.msk [vmem:[%s1943_s14] sm:$0xff] %vm998_vm2, %v995_v51  ;;  %v892_v55 = vsel %vm891_vm3, %v888_v50, -inf }
 0x4b1   :  { %893 = vmax.xlane.f32.xlu0 %v892_v55 }
 0x53e   :  { %v894_v56 = vpop.xlane.xlu0 %893 }
 0x53f   :  { %v895_v57 = vsub.f32 %v888_v50, %v894_v56 }
 0x541   :  { %v896_v58 = vmul.f32 1.442695, %v895_v57 }
 0x543   :  { %1378 = vpow2.f32 %v896_v58 }
 0x54d   :  { %v1379_v59 = vpop.eup %1378 }
 0x54e   :  { %v898_v60 = vsel %vm891_vm3, %v1379_v59, 0.0 }
 0x54f   :  { %899 = vadd.xlane.f32.xlu0 %v898_v60 }
 0x5dc   :  { %v900_v61 = vpop.xlane.xlu0 %899 }
 0x5dd   :  { %1380 = vlog2.f32 %v900_v61 }
 0x5e7   :  { %v1381_v62 = vpop.eup %1380 }
 0x5e8   :  { %v902_v63 = vmul.f32 0.6931472, %v1381_v62 }
 0x5ea   :  { %v903_v0 = vsub.f32 %v895_v57, %v902_v63 }
 0x5ec   :  { %904 = vst.msk [vmem:[%s1944_s13] sm:$0xff] %vm891_vm3, %v903_v0 }

</bundles_post_ra>
